<compile_context>
chip_gen: v7x
topology: tpu7x:2x2x1
jax: 0.10.0
libtpu: 0.0.40
codegen_flags: <defaults>
</compile_context>

<pallas_src>
import jax
import jax.numpy as jnp
import numpy as np
from jax.experimental import pallas as pl
from jax.experimental.pallas import tpu as pltpu

EPS = 1e-5  # nn.BatchNorm2d default


def _round_up(x, m):
    return ((x + m - 1) // m) * m


def _pick_hw_tile(hw, n_images, patch_col_bytes):
    """Lane tile over H*W: multiple of 128 dividing hw, double-buffered patch
    tile under ~6 MiB, as many grid steps as reasonable (>= 8 preferred)."""
    assert hw % 128 == 0, "H*W must be a multiple of 128"  # TODO(synk): pad HW
    budget = 6 * 1024 * 1024
    cands = [t for t in (2048, 1024, 512, 256, 128)
             if hw % t == 0 and 2 * t * patch_col_bytes <= budget]
    if not cands:
        cands = [128]
    for t in cands:                       # descending: largest tile w/ >=8 steps
        if (hw // t) * n_images >= 8:
            return t
    return cands[-1]                      # smallest candidate -> most steps


# ---------------- kernel 1: conv-as-matmul + partial BN statistics ----------
def _conv_stats_kernel(p_ref, w_ref, y_ref, st_ref):
    # p_ref : (K, T)    bf16 -- K = 9*Cin patch rows, T spatial columns
    # w_ref : (Cp8, K)  bf16 -- Cout rounded up to a multiple of 8
    # y_ref : (Cp8, T)  bf16 -- conv output, channels on sublanes (lane-dense)
    # st_ref: (Cp8, 128) f32 -- lane 0 = per-channel sum, lane 1 = sum of sq.
    y = jnp.dot(w_ref[...], p_ref[...], preferred_element_type=jnp.float32)
    y_ref[...] = y.astype(y_ref.dtype)
    s = jnp.sum(y, axis=1, keepdims=True)            # (Cp8, 1), f32
    ss = jnp.sum(y * y, axis=1, keepdims=True)       # (Cp8, 1), f32
    lanes = jax.lax.broadcasted_iota(jnp.int32, st_ref.shape, 1)
    st_ref[...] = jnp.where(lanes == 0, s, jnp.where(lanes == 1, ss, 0.0))


# ---------------- kernel 2: normalize + ReLU (already channels-major) -------
def _bn_relu_kernel(y_ref, sc_ref, sh_ref, o_ref):
    # y_ref: (Cp8, T) bf16   sc/sh: (Cp8, 1) f32   o_ref: (Cout, T) f32
    z = y_ref[...].astype(jnp.float32) * sc_ref[...] + sh_ref[...]
    o_ref[...] = jnp.maximum(z[:o_ref.shape[0], :], 0.0)


def conv_block_forward(x_nchw, w_oihw, bias, gamma, beta):
    # `bias` is intentionally unused: training-mode BatchNorm's batch-mean
    # subtraction cancels a per-channel constant bias exactly.
    del bias
    N, Cin, H, W = x_nchw.shape
    Cout = w_oihw.shape[0]
    Cp8 = _round_up(Cout, 8)
    K = 9 * Cin
    HW = H * W

    # ---- glue (plain JAX, bf16, NCHW throughout): pad + 9 taps -------------
    x = x_nchw.astype(jnp.bfloat16)                       # cast BEFORE glue
    x_pad = jnp.pad(x, ((0, 0), (0, 0), (1, 1), (1, 1)))
    taps = [x_pad[:, :, kh:kh + H, kw:kw + W].reshape(N, Cin, HW)
            for kh in range(3) for kw in range(3)]
    patches = jnp.concatenate(taps, axis=1)               # (N, 9*Cin, HW)

    # weights: (Cout, Cin, 3, 3) -> (Cp8, 9*Cin), tap-major K to match patches
    wmat = jnp.transpose(w_oihw, (0, 2, 3, 1)).reshape(Cout, K)
    wmat = jnp.pad(wmat, ((0, Cp8 - Cout), (0, 0))).astype(jnp.bfloat16)

    T = _pick_hw_tile(HW, N, K * 2)
    n_hw = HW // T

    # ---- Pallas kernel 1: conv matmul (channels on sublanes) + stats -------
    y, stats = pl.pallas_call(
        _conv_stats_kernel,
        out_shape=(jax.ShapeDtypeStruct((N, Cp8, HW), jnp.bfloat16),
                   jax.ShapeDtypeStruct((N, n_hw, Cp8, 128), jnp.float32)),
        grid=(N, n_hw),
        in_specs=[
            pl.BlockSpec((None, K, T), lambda n, t: (n, 0, t)),
            pl.BlockSpec((Cp8, K), lambda n, t: (0, 0)),
        ],
        out_specs=(
            pl.BlockSpec((None, Cp8, T), lambda n, t: (n, 0, t)),
            pl.BlockSpec((None, None, Cp8, 128), lambda n, t: (n, t, 0, 0)),
        ),
        compiler_params=pltpu.CompilerParams(
            dimension_semantics=("parallel", "parallel"),
            allow_input_fusion=[True, False]),
    )(patches, wmat)

    # ---- finalize BN batch statistics (tiny Cp8 vectors, plain JAX) --------
    cnt = N * HW
    tot = jnp.sum(stats[..., 0], axis=(0, 1))              # (Cp8,)
    tot_sq = jnp.sum(stats[..., 1], axis=(0, 1))           # (Cp8,)
    mean = tot / cnt
    var = jnp.maximum(tot_sq / cnt - mean * mean, 0.0)      # biased var (PyTorch)
    inv = jax.lax.rsqrt(var + EPS)
    g = jnp.pad(gamma.astype(jnp.float32), (0, Cp8 - Cout))
    b = jnp.pad(beta.astype(jnp.float32), (0, Cp8 - Cout))
    scale = (g * inv).reshape(Cp8, 1)
    shift = (b - mean * g * inv).reshape(Cp8, 1)

    # ---- Pallas kernel 2: normalize + ReLU, unpadded channels-major out ----
    out = pl.pallas_call(
        _bn_relu_kernel,
        out_shape=jax.ShapeDtypeStruct((N, Cout, HW), jnp.float32),
        grid=(N, n_hw),
        in_specs=[
            pl.BlockSpec((None, Cp8, T), lambda n, t: (n, 0, t)),
            pl.BlockSpec((Cp8, 1), lambda n, t: (0, 0)),
            pl.BlockSpec((Cp8, 1), lambda n, t: (0, 0)),
        ],
        out_specs=pl.BlockSpec((None, Cout, T), lambda n, t: (n, 0, t)),
        compiler_params=pltpu.CompilerParams(
            dimension_semantics=("parallel", "parallel")),
    )(y, scale, shift)

    return out.reshape(N, Cout, H, W)


# ---- pure-JAX f32 reference (conv + bias + train-mode BN + ReLU) ----
def _reference(x, w, b, gamma, beta):
    y = jax.lax.conv_general_dilated(
        x, w, window_strides=(1, 1), padding=((1, 1), (1, 1)),
        dimension_numbers=("NCHW", "OIHW", "NCHW"))
    y = y + b.reshape(1, -1, 1, 1)
    mean = y.mean(axis=(0, 2, 3), keepdims=True)
    var = ((y - mean) ** 2).mean(axis=(0, 2, 3), keepdims=True)
    y = (y - mean) * jax.lax.rsqrt(var + EPS)
    y = y * gamma.reshape(1, -1, 1, 1) + beta.reshape(1, -1, 1, 1)
    return jnp.maximum(y, 0.0)


if __name__ == "__main__":
    N, Cin, Cout, H, W = 2, 4, 8, 16, 16

    key = jax.random.PRNGKey(0)
    kx, kw, kb = jax.random.split(key, 3)
    x = jax.random.normal(kx, (N, Cin, H, W), dtype=jnp.float32)
    w = 0.1 * jax.random.normal(kw, (Cout, Cin, 3, 3), dtype=jnp.float32)
    b = 0.05 * jax.random.normal(kb, (Cout,), dtype=jnp.float32)
    gamma = jnp.ones((Cout,), dtype=jnp.float32)   # BN weight default
    beta = jnp.zeros((Cout,), dtype=jnp.float32)   # BN bias default

    out = jax.block_until_ready(conv_block_forward(x, w, b, gamma, beta))
    ref = jax.block_until_ready(_reference(x, w, b, gamma, beta))

    assert out.shape == (N, Cout, H, W)
    # tolerance loosened slightly for bf16 MXU inputs + bf16 intermediate
    # (stats reduction and BN math are f32)
    np.testing.assert_allclose(np.asarray(out), np.asarray(ref),
                               rtol=2e-2, atol=2e-2)
    print("KERNEL_OK")
</pallas_src>

<mosaic_0001>
module attributes {stable_mosaic.version = 11 : i64} {
  func.func @_conv_stats_kernel(%arg0: i32, %arg1: i32, %arg2: memref<1x36x128xbf16, #tpu.memory_space<vmem>>, %arg3: memref<8x36xbf16, #tpu.memory_space<vmem>>, %arg4: memref<1x8x128xbf16, #tpu.memory_space<vmem>>, %arg5: memref<1x1x8x128xf32, #tpu.memory_space<vmem>>) attributes {dimension_semantics = [#tpu.dimension_semantics<parallel>, #tpu.dimension_semantics<parallel>], iteration_bounds = array<i64: 2, 2>, scalar_prefetch = 0 : i64, scratch_operands = 0 : i64, tpu.core_type = #tpu.core_type<tc>, window_params = [{transform_indices = @transform_0, window_bounds = array<i64: 1, 36, 128>}, {pipeline_mode = #tpu.pipeline_mode<synchronous>, transform_indices = @transform_1, window_bounds = array<i64: 8, 36>}, {transform_indices = @transform_2, window_bounds = array<i64: 1, 8, 128>}, {transform_indices = @transform_3, window_bounds = array<i64: 1, 1, 8, 128>}]} {
    %c0 = arith.constant 0 : index
    %c0_0 = arith.constant 0 : index
    %0 = vector.load %arg3[%c0, %c0_0] : memref<8x36xbf16, #tpu.memory_space<vmem>>, vector<8x36xbf16>
    %c0_1 = arith.constant 0 : index
    %c0_2 = arith.constant 0 : index
    %c0_3 = arith.constant 0 : index
    %1 = vector.load %arg2[%c0_1, %c0_2, %c0_3] : memref<1x36x128xbf16, #tpu.memory_space<vmem>>, vector<1x36x128xbf16>
    %2 = vector.shape_cast %1 : vector<1x36x128xbf16> to vector<36x128xbf16>
    %cst = arith.constant dense<0.000000e+00> : vector<8x128xf32>
    %3 = tpu.matmul %0, %2, %cst {dimension_numbers = #tpu.dot_dimension_numbers<[1], [0], [0], [1], [0, 0, 1, 1], [], []>} : vector<8x36xbf16>, vector<36x128xbf16>, vector<8x128xf32> -> vector<8x128xf32>
    %4 = arith.truncf %3 : vector<8x128xf32> to vector<8x128xbf16>
    %c0_4 = arith.constant 0 : index
    %c0_5 = arith.constant 0 : index
    %c0_6 = arith.constant 0 : index
    %5 = vector.load %arg4[%c0_4, %c0_5, %c0_6] : memref<1x8x128xbf16, #tpu.memory_space<vmem>>, vector<1x8x128xbf16>
    %6 = vector.shape_cast %5 : vector<1x8x128xbf16> to vector<8x128xbf16>
    %7 = vector.shape_cast %4 : vector<8x128xbf16> to vector<1x8x128xbf16>
    tpu.vector_store %arg4[%c0_4, %c0_5, %c0_6], %7 {strides = array<i32>} : memref<1x8x128xbf16, #tpu.memory_space<vmem>>, vector<1x8x128xbf16>,
    %cst_7 = arith.constant dense<0.000000e+00> : vector<8xf32>
    %8 = vector.multi_reduction <add>, %3, %cst_7 [1] : vector<8x128xf32> to vector<8xf32>
    %9 = vector.shape_cast %8 : vector<8xf32> to vector<8x1xf32>
    %10 = arith.mulf %3, %3 : vector<8x128xf32>
    %cst_8 = arith.constant dense<0.000000e+00> : vector<8xf32>
    %11 = vector.multi_reduction <add>, %10, %cst_8 [1] : vector<8x128xf32> to vector<8xf32>
    %12 = vector.shape_cast %11 : vector<8xf32> to vector<8x1xf32>
    %13 = tpu.iota {dimensions = array<i32: 1>} : vector<8x128xi32>
    %c0_i32 = arith.constant 0 : i32
    %14 = vector.broadcast %c0_i32 : i32 to vector<8x128xi32>
    %15 = arith.cmpi eq, %13, %14 : vector<8x128xi32>
    %c1_i32 = arith.constant 1 : i32
    %16 = vector.broadcast %c1_i32 : i32 to vector<8x128xi32>
    %17 = arith.cmpi eq, %13, %16 : vector<8x128xi32>
    %cst_9 = arith.constant 0.000000e+00 : f32
    %18 = vector.shape_cast %12 : vector<8x1xf32> to vector<8x1xf32>
    %19 = vector.broadcast %18 : vector<8x1xf32> to vector<8x128xf32>
    %20 = vector.broadcast %cst_9 : f32 to vector<8x128xf32>
    %21 = arith.select %17, %19, %20 : vector<8x128xi1>, vector<8x128xf32>
    %22 = vector.shape_cast %9 : vector<8x1xf32> to vector<8x1xf32>
    %23 = vector.broadcast %22 : vector<8x1xf32> to vector<8x128xf32>
    %24 = arith.select %15, %23, %21 : vector<8x128xi1>, vector<8x128xf32>
    %c0_10 = arith.constant 0 : index
    %c0_11 = arith.constant 0 : index
    %c0_12 = arith.constant 0 : index
    %c0_13 = arith.constant 0 : index
    %25 = vector.load %arg5[%c0_10, %c0_11, %c0_12, %c0_13] : memref<1x1x8x128xf32, #tpu.memory_space<vmem>>, vector<1x1x8x128xf32>
    %26 = vector.shape_cast %25 : vector<1x1x8x128xf32> to vector<8x128xf32>
    %27 = vector.shape_cast %24 : vector<8x128xf32> to vector<1x1x8x128xf32>
    tpu.vector_store %arg5[%c0_10, %c0_11, %c0_12, %c0_13], %27 {strides = array<i32>} : memref<1x1x8x128xf32, #tpu.memory_space<vmem>>, vector<1x1x8x128xf32>,
    return
  }
  func.func @transform_0(%arg0: i32, %arg1: i32) -> (i32, i32, i32) {
    %c0_i32 = arith.constant 0 : i32
    %c0_i32_0 = arith.constant 0 : i32
    return %arg0, %c0_i32, %arg1 : i32, i32, i32
  }
  func.func @transform_1(%arg0: i32, %arg1: i32) -> (i32, i32) {
    %c0_i32 = arith.constant 0 : i32
    %c0_i32_0 = arith.constant 0 : i32
    %c0_i32_1 = arith.constant 0 : i32
    return %c0_i32, %c0_i32_0 : i32, i32
  }
  func.func @transform_2(%arg0: i32, %arg1: i32) -> (i32, i32, i32) {
    %c0_i32 = arith.constant 0 : i32
    %c0_i32_0 = arith.constant 0 : i32
    return %arg0, %c0_i32, %arg1 : i32, i32, i32
  }
  func.func @transform_3(%arg0: i32, %arg1: i32) -> (i32, i32, i32, i32) {
    %c0_i32 = arith.constant 0 : i32
    %c0_i32_0 = arith.constant 0 : i32
    %c0_i32_1 = arith.constant 0 : i32
    return %arg0, %arg1, %c0_i32, %c0_i32_0 : i32, i32, i32, i32
  }
}

</mosaic_0001>

<bundles_post_ra>
// kernel: tpu_custom_call.1
= control target key start
LH: loop header
LB: loop body
LE: loop exit
PB: predicated region body
PF: predicated region fallthrough
CT: control target
= control target key end

     0   :  { %9 = vsyncpa [#allocation4], 0  ;;  %s941_s0 = inlined_call_operand.vmem [shape: bf16[2,36,256], index: 0, kind: input, shape index: {}]   ;;  %s942_s1 = inlined_call_operand.vmem [shape: bf16[8,36], index: 1, kind: input, shape index: {}]   ;;  %s943_s2 = inlined_call_operand.hbm [shape: bf16[2,8,256], index: 2, kind: output, shape index: {0}]   ;;  %s944_s3 = inlined_call_operand.hbm [shape: f32[2,2,8,128], index: 3, kind: output, shape index: {1}]  }
   0x1   :  { %11 = vsyncpa [#allocation4 + $0x1], 0 }
   0x2   :  { %12 = vsyncpa [#allocation6], 0 }
   0x3   :  { %14 = vsyncpa [#allocation6 + $0x1], 0  ;;  %s761_s12 = smov 0   ;;  %s763_s13 = smov 0  }
   0x4   :  { %s765_s14 = smov 0   ;;  %s767_s15 = smov 0  }
   0x5   :  { %s769_s16 = smov 0   ;;  %s771_s17 = smov 0  }
   0x6   :  { %s773_s18 = smov 0   ;;  %s775_s19 = smov 0  }
   0x7 LB: > { %s491_s20 = sadd.s32 4294967295, %s735_s19   ;;  %s492_s21 = sadd.s32 4294967294, %s735_s19   ;;  %s735_s19 = sphi %s775_s19, %s20_s19   ;;  %s731_s18 = sphi %s773_s18, %s954_s18   ;;  %s727_s17 = sphi %s771_s17, %s953_s17   ;;  %s723_s16 = sphi %s769_s16, %s952_s16   ;;  %s719_s15 = sphi %s767_s15, %s951_s15   ;;  %s715_s14 = sphi %s765_s14, %s950_s14   ;;  %s711_s13 = sphi %s763_s13, %s949_s13   ;;  %s707_s12 = sphi %s761_s12, %s948_s12  }
   0x8   : > { %s29_s22 = sadd.s32 1, %s727_s17  ;;  %s32_s23 = sadd.s32 1, %s731_s18 }
   0x9   : > { %p30_p0 = scmp.ge.s32.totalorder %s29_s22, 2  ;;  %p48_p1 = scmp.ne.s32.totalorder %s715_s14, %s711_s13 }
   0xa   : > { %p49_p2 = scmp.eq.s32.totalorder %s735_s19, 0  ;;  %p101_p5 = scmp.eq.s32.totalorder %s491_s20, 3 }
   0xb   : > { %s956_s22 = smov (%p30_p0, %s29_s22), 0  ;;  %s958_s23 = smov (!%p30_p0, %s32_s23), %s731_s18 }
   0xc   : > { %s37_s24 = ssub.s32 %s727_s17, %s956_s22  ;;  %p813_p3 = por %p49_p2, %p48_p1 }
   0xd   : > { %p34_p4 = scmp.ge.s32.totalorder %s958_s23, 2  ;;  %p106_p6 = scmp.ne.s32.totalorder %s711_s13, %s707_s12 }
   0xe   : > { %p107_p7 = scmp.eq.s32.totalorder %s492_s21, 3  ;;  %p821_p8 = por %p101_p5, %p48_p1 }
   0xf   : > { %s960_s23 = smov (%p34_p4, %s958_s23), 0  ;;  %s41_s30 = sadd.s32 1, %s715_s14 }
  0x10   : > { %p825_p9 = por %p107_p7, %p106_p6  ;;  %s36_s28 = ssub.s32 %s731_s18, %s960_s23 }
  0x11   : > { %s38_s29 = sor.u32 %s37_s24, %s36_s28  ;;  %p494_p11 = scmp.ge.s32.totalorder %s735_s19, 4 }
  0x12   : > { %p39_p10 = scmp.eq.s32.totalorder %s38_s29, 0 }
  0x13   : > { %154 = sbr.rel (%p494_p11) target bundleno = 36 (0x24), region = 20 }
  0x14   : > { %s833_s4 = scalar_select %p39_p10, %s715_s14, %s41_s30  }
  0x1a   : > { %157 = sbr.rel (!%p813_p3) target bundleno = 36 (0x24), region = 24  ;;  %s159_s5 = sand.u32 (%p813_p3), 1, %s715_s14  }
  0x1b   : > { %s526_s6 = smul.u32 (%p813_p3), 10, %s731_s18 }
  0x1c   : > { %s525_s7 = smul.u32 (%p813_p3), 20, %s159_s5 }
  0x1d   : > { %s163_s8 = sadd.s32 (%p813_p3), %s727_s17, %s526_s6 }
  0x1e   : > { %s495_s9 = sshll.u32 (%p813_p3), %s163_s8, 2  ;;  %s161_s21 = scalar_lea.vmem (%p813_p3), [#allocation2], %s525_s7 }
  0x1f   : > { %s165_s20 = scalar_lea.vmem (%p813_p3), %s941_s0, %s495_s9 }
  0x20   : > { %v181_v0 = vld [vmem:[%s165_s20] sm:$0xf] (%p813_p3)  ;;  %v183_v1 = vld [vmem:[%s165_s20 + $0x8] sm:$0xf] (%p813_p3)  ;;  %v185_v2 = vld [vmem:[%s165_s20 + $0x10] sm:$0xf] (%p813_p3) }
  0x21   : > { %182 = vst [vmem:[%s161_s21] sm:$0xf] %v181_v0  ;;  %184 = vst [vmem:[%s161_s21 + $0x4] sm:$0xf] %v183_v1  ;;  %v187_v3 = vld [vmem:[%s165_s20 + $0x18] sm:$0xf] }
  0x22   : > { %186 = vst [vmem:[%s161_s21 + $0x8] sm:$0xf] %v185_v2  ;;  %v189_v4 = vld [vmem:[%s165_s20 + $0x20] sm:$0xf]  ;;  %188 = vst [vmem:[%s161_s21 + $0xc] sm:$0xf] %v187_v3 }
  0x23   : > { %190 = vst [vmem:[%s161_s21 + $0x10] sm:$0xf] %v189_v4 }
  0x24 PF: > { %p496_p12 = scmp.ge.s32.totalorder %s735_s19, 1  ;;  %p222_p13 = scmp.lt.s32.totalorder %s735_s19, 5 }
  0x26   : > { %p223_p0 = pnand %p496_p12, %p222_p13 }
  0x27   : > { %s847_s24 = sand.u32 (!%p223_p0), 1, %s711_s13   ;;  %v737_v5 = vmov (!%p223_p0), 0.0   ;;  %vm738_vm0 = vmmov (!%p223_p0), 0   ;;  %vm283_vm1 = vcmask (!%p223_p0), 1041408   ;;  %v258_v10 = vld [vmem:[%s942_s1] sm:$0xf] (!%p223_p0) }
  0x28   : > { %226 = sbr.rel (%p223_p0) target bundleno = 431 (0x1af), region = 65  ;;  %515 = vmatprep.subr.bf16.mxu0 (!%p223_p0), %v737_v5  ;;  %521 = vmatprep.mubr.msk.bf16.mxu0 (!%p223_p0), %vm738_vm0, %v737_v5  ;;  %vm279_vm2 = vcmask (!%p223_p0), 293888   ;;  %s497_s5 = sshll.u32 (!%p223_p0), %s847_s24, 2 }
  0x29   : > { %s527_s25 = smul.u32 (!%p223_p0), 20, %s847_s24  ;;  %s249_s6 = scalar_lea.vmem (!%p223_p0), [#allocation3], %s497_s5 }
  0x2a   : > { %s505_s7 = sshll.u32 (!%p223_p0), %s723_s16, 1  ;;  %s362_s10 = sshll.u32 (!%p223_p0), %s249_s6, 4  ;;  %s363_s10 = int_to_ptr.vmem [resolvable:$true] %s362_s10 }
  0x2b   : > { %s231_s28 = scalar_lea.vmem (!%p223_p0), [#allocation2], %s527_s25  ;;  %s856_s8 = sadd.s32 (!%p223_p0), %s719_s15, %s505_s7 }
  0x2c   : > { %v606_v6 = vld [vmem:[%s231_s28] sm:$0xff] (!%p223_p0)   ;;  %v607_v7 = vld [vmem:[%s231_s28 + $0x8] sm:$0xff] (!%p223_p0)   ;;  %v608_v8 = vld [vmem:[%s231_s28 + $0x10] ss:$0 sps:$4 sm:$0x33] (!%p223_p0)   ;;  %s506_s9 = sshll.u32 (!%p223_p0), %s856_s8, 6 }
  0x2d   : > { %516 = vmatpush3.bf16.msra.mxu0 (!%p223_p0), %v606_v6  ;;  %v285_v9 = vsel (!%p223_p0), %vm283_vm1, %v608_v8, 0  ;;  %s862_s21 = scalar_lea.hbm (!%p223_p0), %s943_s2, %s506_s9  ;;  %s342_s25 = scalar_lea.sflag (!%p223_p0), [#allocation4], %s847_s24 }
  0x2e   : > { %517 = vmatprep.subr.bf16.mxu0 (!%p223_p0), %v737_v5  ;;  %s609_s28 = scalar_lea.vmem (!%p223_p0), %s363_s10, 64  ;;  %s739_s29 = smov (!%p223_p0), [#allocation3]  }
  0x2f   : > { %p610_p1 = scmp.ne.s32.totalorder %s363_s10, %s609_s28  ;;  %s613_s30 = sshll.u32 %s739_s29, 4  ;;  %s614_s30 = int_to_ptr.vmem [resolvable:$false] %s613_s30 }
  0x30   : > { %s615_s15 = scalar_lea.vmem %s614_s30, 128  ;;  %p616_p4 = scmp.lt.s32.totalorder %s363_s10, %s614_s30 }
  0x31   : > { %518 = vmatpush3.bf16.msra.mxu0 %v607_v7  ;;  %p611_p2 = pnand %p610_p1, %p821_p8  ;;  %p617_p5 = scmp.lt.s32.totalorder %s615_s15, %s609_s28 }
  0x32   : > { %519 = vmatprep.subr.bf16.mxu0 %v737_v5 }
  0x33   : > { %p612_p3 = pneg %p611_p2  ;;  %p618_p6 = por %p617_p5, %p616_p4 }
  0x35   : > { %520 = vmatpush3.bf16.msra.mxu0 %v285_v9  ;;  %p619_p7 = pnand %p618_p6, %p612_p3 }
  0x38   : > { %522 = vmatmul.mubr.msk.bf16.vlgmr.msra.gmra.mrb[0].mxu0 %vm279_vm2, %v258_v10 }
 0x10b   : > { %v321_v11 = vpop.f32.mrb[0].mxu0 }
 0x10c   : > { %v327_v12 = vpack.c.bf16 %v321_v11, %v321_v11  ;;  %v523_v13 = vpop.f32.mrb[1].mxu0  ;;  %v331_v14 = vmul.f32 %v321_v11, %v321_v11 }
 0x10d   : > { %v324_v15 = vpop.f32.mrb[2].mxu0 }
 0x10e   : > { %332 = vadd.xlane.f32.xlu0 %v331_v14  ;;  %v524_v16 = vpop.f32.mrb[3].mxu0  ;;  %328 = vst [vmem:[%s249_s6] sm:$0xf] %v327_v12 }
 0x112   : > { %329 = vadd.xlane.f32.xlu0 %v321_v11 }
 0x113   : > { %622 = shalt.err (!%p619_p7)
}
 0x114   : > { %s623_s16 = scalar_lea.hbm %s862_s21, 64  ;;  %s627_s7 = scalar_lea.hbm %s943_s2, 256 }
 0x115   : > { %p624_p10 = scmp.ne.s32.totalorder %s862_s21, %s623_s16  ;;  %p628_p13 = scmp.lt.u32.totalorder %s862_s21, %s943_s2 }
 0x116   : > { %p629_p0 = scmp.lt.u32.totalorder %s627_s7, %s623_s16  ;;  %p631_p2 = scmp.lt.u32.totalorder %s623_s16, %s862_s21 }
 0x117   : > { %p625_p11 = pnand %p624_p10, %p821_p8 }
 0x118   : > { %p630_p1 = por %p629_p0, %p628_p13 }
 0x119   : > { %p626_p12 = pneg %p625_p11 }
 0x11a   : > { %p632_p3 = por %p631_p2, %p630_p1 }
 0x11c   : > { %p633_p4 = pnand %p632_p3, %p626_p12 }
 0x11e   : > { %636 = shalt.err (!%p633_p4)
}
 0x11f   : > { %528 = dma.vmem_to_hbm [thread:$0]  (%p821_p8), %s363_s10, 64, %s862_s21, %s342_s25   ;;  %v334_v17 = vlaneseq }
 0x120   : > { %s498_s20 = sshll.u32 %s847_s24, 3  ;;  %s508_s28 = sshll.u32 %s856_s8, 7 }
 0x121   : > { %v335_v18 = vand.u32 127, %v334_v17  ;;  %s256_s29 = scalar_lea.vmem [#allocation5], %s498_s20  ;;  %s887_s5 = scalar_lea.hbm %s944_s3, %s508_s28 }
 0x122   : > { %s377_s30 = sshll.u32 %s256_s29, 4  ;;  %s347_s10 = scalar_lea.sflag [#allocation6], %s847_s24  ;;  %s889_s30 = int_to_ptr.vmem [resolvable:$true] %s377_s30 }
 0x123   : > { %vm337_vm3 = vcmp.eq.s32.totalorder %v335_v18, 1  ;;  %vm336_vm4 = vcmp.eq.s32.totalorder %v335_v18, 0  ;;  %s637_s21 = scalar_lea.vmem %s889_s30, 128  ;;  %s740_s8 = smov [#allocation5]  }
 0x124   : > { %p638_p5 = scmp.ne.s32.totalorder %s889_s30, %s637_s21  ;;  %s641_s25 = sshll.u32 %s740_s8, 4  ;;  %s642_s25 = int_to_ptr.vmem [resolvable:$false] %s641_s25 }
 0x125   : > { %s643_s6 = scalar_lea.vmem %s642_s25, 256  ;;  %p644_p10 = scmp.lt.s32.totalorder %s889_s30, %s642_s25 }
 0x126   : > { %p639_p6 = pnand %p638_p5, %p821_p8  ;;  %p645_p11 = scmp.lt.s32.totalorder %s643_s6, %s637_s21 }
 0x128   : > { %p640_p7 = pneg %p639_p6  ;;  %p646_p12 = por %p645_p11, %p644_p10 }
 0x12a   : > { %p647_p13 = pnand %p646_p12, %p640_p7 }
 0x19b   : > { %v333_v19 = vpop.xlane.xlu0 %332 }
 0x19c   : > { %v338_v20 = vsel %vm337_vm3, %v333_v19, 0.0 }
 0x19f   : > { %v330_v21 = vpop.xlane.xlu0 %329 }
 0x1a0   : > { %v339_v22 = vsel %vm336_vm4, %v330_v21, %v338_v20 }
 0x1a1   : > { %340 = vst [vmem:[%s256_s29] sm:$0xff] %v339_v22 }
 0x1a2   : > { %650 = shalt.err (!%p647_p13)
}
 0x1a3   : > { %s651_s24 = scalar_lea.hbm %s887_s5, 128  ;;  %s655_s11 = scalar_lea.hbm %s944_s3, 512 }
 0x1a4   : > { %p652_p0 = scmp.ne.s32.totalorder %s887_s5, %s651_s24  ;;  %p656_p3 = scmp.lt.u32.totalorder %s887_s5, %s944_s3 }
 0x1a5   : > { %p657_p4 = scmp.lt.u32.totalorder %s655_s11, %s651_s24  ;;  %p659_p6 = scmp.lt.u32.totalorder %s651_s24, %s887_s5 }
 0x1a6   : > { %p653_p1 = pnand %p652_p0, %p821_p8 }
 0x1a7   : > { %p658_p5 = por %p657_p4, %p656_p3 }
 0x1a8   : > { %p654_p2 = pneg %p653_p1 }
 0x1a9   : > { %p660_p7 = por %p659_p6, %p658_p5 }
 0x1ab   : > { %p661_p10 = pnand %p660_p7, %p654_p2 }
 0x1ad   : > { %664 = shalt.err (!%p661_p10)
}
 0x1ae   : > { %529 = dma.vmem_to_hbm [thread:$0]  (%p821_p8), %s889_s30, 128, %s887_s5, %s347_s10  }
 0x1af PF: > { %p539_p11 = scmp.ge.s32.totalorder %s735_s19, 2  ;;  %s389_s29 = sand.u32 1, %s707_s12  }
 0x1b0   : > { %s390_s15 = scalar_lea.sflag [#allocation4], %s389_s29 }
 0x1b1   : > { %p533_p12 = pnand %p539_p11, %p825_p9 }
 0x1b3   : > { %698 = dma.done.wait (!%p533_p12), %s390_s15, 64  }
 0x1b4   : > { %700 = vsyncadd (!%p533_p12), %s390_s15, 4294967232  ;;  %s399_s16 = scalar_lea.sflag [#allocation6], %s389_s29 }
 0x1b5   : > { %702 = dma.done.wait (!%p533_p12), %s399_s16, 128  }
 0x1b6   : > { %704 = vsyncadd (!%p533_p12), %s399_s16, 4294967168  ;;  %s20_s19 = sadd.s32 1, %s735_s19   ;;  %s948_s12 = smov %s711_s13 }
 0x1b7   : > { %p17_p13 = scmp.ge.s32.totalorder %s20_s19, 6   ;;  %s949_s13 = smov %s715_s14 }
 0x1b8   : > { %s950_s14 = smov %s833_s4  ;;  %s951_s15 = smov %s727_s17 }
 0x1b9   : > { %s952_s16 = smov %s731_s18  ;;  %s953_s17 = smov %s956_s22 }
 0x1ba   : > { %s954_s18 = smov %s960_s23  ;;  %19 = sbr.rel (!%p17_p13) target bundleno = 7 (0x7), region = 126 }
 0x1c1   :  { %404 = vsyncpa [#allocation4], 1 }
 0x1c2   :  { %406 = vsyncpa [#allocation4 + $0x1], 1 }
 0x1c3   :  { %407 = vsyncpa [#allocation6], 1 }
 0x1c4   :  { %409 = vsyncpa [#allocation6 + $0x1], 1 }

</bundles_post_ra>
